<compile_context>
chip_gen: v7x
topology: tpu7x:2x2x1
jax: 0.10.0
libtpu: 0.0.40
codegen_flags: <defaults>
</compile_context>

<pallas_src>
import functools
import math

import jax
import jax.numpy as jnp
from jax.experimental import pallas as pl
from jax.experimental.pallas import tpu as pltpu

LANE = 128                                   # per-head feature slab width
_VMEM_LIMIT_BYTES = 48 * 1024 * 1024         # < v7x 64 MiB physical, > 32 MiB default


def _round_up(x, m):
    return (x + m - 1) // m * m


def _choose_tiles(n):
    """Pad N to a 128 multiple (MXU/lane alignment) and pick a row tile."""
    n_pad = _round_up(max(n, LANE), LANE)
    tile_i = 256 if (n_pad % 256 == 0 and n_pad <= 8192) else 128
    return n_pad, tile_i


# ---------------------------------------------------------------------------
# Kernel 1: fused projection  H = X @ W_all  (all heads in one matmul)
# ---------------------------------------------------------------------------
def _gat_proj_kernel(x_ref, w_ref, h_ref):
    h_ref[...] = jnp.dot(x_ref[...], w_ref[...],
                         preferred_element_type=jnp.float32).astype(h_ref.dtype)


# ---------------------------------------------------------------------------
# Kernel 2: attention + aggregation for one (head, destination row tile)
# ---------------------------------------------------------------------------
def _gat_attn_kernel(h_all_ref, h_dst_ref, adj_ref, asrc_ref, adst_ref, b_ref,
                     o_ref, *, apply_relu, neg_slope):
    h_all = h_all_ref[...]                               # (Np, LANE) f32
    a_src = asrc_ref[0]                                  # (1, LANE)  f32
    a_dst = adst_ref[0]                                  # (1, LANE)  f32

    # alpha_src over ALL source nodes as a row vector: tiny (1, Np) matvec.
    alpha_src_row = jax.lax.dot_general(
        a_src, h_all, (((1,), (1,)), ((), ())),
        preferred_element_type=jnp.float32)              # (1, Np)
    # alpha_dst for this tile's destination nodes: lane reduce.
    alpha_dst = jnp.sum(h_dst_ref[...] * a_dst, axis=-1, keepdims=True)  # (T,1)

    # logits -> LeakyReLU -> int8 neighbour mask -> numerically-stable exp
    e = alpha_dst + alpha_src_row                        # (T, Np)
    e = jnp.maximum(e, neg_slope * e)                    # LeakyReLU (slope < 1)
    e = jnp.where(adj_ref[...] != 0, e, jnp.float32(-1e30))
    m = jnp.max(e, axis=-1, keepdims=True)
    p = jnp.exp(e - m)                                   # unnormalized weights
    denom = jnp.sum(p, axis=-1, keepdims=True)           # (T, 1)

    # aggregate UNNORMALIZED on the MXU (bf16 x bf16 -> f32 acc), rescale after
    out = jnp.dot(p.astype(jnp.bfloat16), h_all.astype(jnp.bfloat16),
                  preferred_element_type=jnp.float32)    # (T, LANE)
    out = out * pl.reciprocal(denom, approx=True)        # EUP divide, T values only
    y = out + b_ref[...]
    if apply_relu:
        y = jnp.maximum(y, 0.0)
    o_ref[...] = y.astype(o_ref.dtype)                   # lane-dense 128-wide store
    # (attention / activation dropout: identity in eval mode)


# ---------------------------------------------------------------------------
# One GATConv layer = projection pass + attention pass
# ---------------------------------------------------------------------------
def gat_layer_pallas(x, w_all, a_src, a_dst, b, adj_i8, *, apply_relu,
                     out_dtype, tile_i):
    """x: (Np, Din_pad) bf16, w_all: (Din_pad, heads*LANE) bf16,
    a_*: (heads,1,LANE) f32, b: (1, heads*LANE) f32, adj_i8: (Np,Np) int8."""
    n_pad, din_pad = x.shape
    heads = a_src.shape[0]
    dout_pad = heads * LANE
    n_tiles = n_pad // tile_i

    # ---- pass 1: H = X @ W_all ----
    proj_flops = 2 * n_pad * din_pad * dout_pad
    proj_bytes = (x.size * x.dtype.itemsize + w_all.size * w_all.dtype.itemsize
                  + n_pad * dout_pad * 4)
    h_proj = pl.pallas_call(
        _gat_proj_kernel,
        out_shape=jax.ShapeDtypeStruct((n_pad, dout_pad), jnp.float32),
        grid=(n_tiles,),
        in_specs=[pl.BlockSpec((tile_i, din_pad), lambda i: (i, 0)),
                  pl.BlockSpec((din_pad, dout_pad), lambda i: (0, 0))],
        out_specs=pl.BlockSpec((tile_i, dout_pad), lambda i: (i, 0)),
        compiler_params=pltpu.CompilerParams(
            dimension_semantics=("parallel",),
            vmem_limit_bytes=_VMEM_LIMIT_BYTES),
        cost_estimate=pl.CostEstimate(flops=int(proj_flops), transcendentals=0,
                                      bytes_accessed=int(proj_bytes)),
    )(x, w_all)

    # ---- pass 2: attention + aggregation over grid (heads, row tiles) ----
    kernel = functools.partial(_gat_attn_kernel, apply_relu=apply_relu,
                               neg_slope=0.2)
    attn_flops = heads * (2 * n_pad * n_pad * LANE        # attn @ H
                          + 2 * n_pad * LANE * n_tiles    # alpha_src matvecs
                          + 2 * n_pad * LANE              # alpha_dst reduces
                          + 8 * n_pad * n_pad)            # logits/softmax VPU work
    attn_trans = heads * n_pad * n_pad
    attn_bytes = (heads * n_pad * n_pad                   # int8 adj, streamed per head
                  + 2 * heads * n_pad * LANE * 4          # H slabs + dst tiles (f32)
                  + n_pad * dout_pad * jnp.dtype(out_dtype).itemsize
                  + (a_src.size + a_dst.size + b.size) * 4)
    return pl.pallas_call(
        kernel,
        out_shape=jax.ShapeDtypeStruct((n_pad, dout_pad), out_dtype),
        grid=(heads, n_tiles),
        in_specs=[
            pl.BlockSpec((n_pad, LANE), lambda h, i: (0, h)),     # H (all sources)
            pl.BlockSpec((tile_i, LANE), lambda h, i: (i, h)),    # H (dst rows)
            pl.BlockSpec((tile_i, n_pad), lambda h, i: (i, 0)),   # adj row tile int8
            pl.BlockSpec((1, 1, LANE), lambda h, i: (h, 0, 0)),   # att_src
            pl.BlockSpec((1, 1, LANE), lambda h, i: (h, 0, 0)),   # att_dst
            pl.BlockSpec((1, LANE), lambda h, i: (0, h)),         # bias slab
        ],
        out_specs=pl.BlockSpec((tile_i, LANE), lambda h, i: (i, h)),
        compiler_params=pltpu.CompilerParams(
            dimension_semantics=("parallel", "parallel"),
            vmem_limit_bytes=_VMEM_LIMIT_BYTES),
        cost_estimate=pl.CostEstimate(flops=int(attn_flops),
                                      transcendentals=int(attn_trans),
                                      bytes_accessed=int(attn_bytes)),
    )(h_proj, h_proj, adj_i8, a_src, a_dst, b)


# ---------------------------------------------------------------------------
# Parameter construction (mimics Custom_GAT's GATConv stack)
# ---------------------------------------------------------------------------
def init_gat_params(key, in_channels, hidden_channels, out_channels,
                    num_layers, heads):
    """Per-layer (W, att_src, att_dst, bias), un-padded. W stored
    (din, heads*f_head) (transposed vs torch); glorot-style init."""
    if num_layers == 1:
        dims = [(in_channels, out_channels // heads)]
    else:
        dims = [(in_channels, hidden_channels // heads)]
        dims += [(hidden_channels, hidden_channels // heads)] * (num_layers - 2)
        dims += [(hidden_channels, out_channels // heads)]
    layers = []
    for din, f in dims:
        key, kw, ks, kd, kb = jax.random.split(key, 5)
        std = math.sqrt(2.0 / (din + heads * f))
        w = std * jax.random.normal(kw, (din, heads * f), jnp.float32)
        att_src = std * jax.random.normal(ks, (heads, f), jnp.float32)
        att_dst = std * jax.random.normal(kd, (heads, f), jnp.float32)
        b = 0.1 * jax.random.normal(kb, (heads * f,), jnp.float32)
        layers.append((w, att_src, att_dst, b))
    return layers


def pad_gat_params(layers, in_channels, heads):
    """Embed parameters into the 128-lane head-slab layout.

    W is stored as one (Din_pad, heads*LANE) matrix so the projection is a
    single fused matmul across all heads."""
    padded = []
    # segments: (padded_row_offset, real_row_offset, count) mapping the real
    # rows of W to padded input rows (layer 0: contiguous; later: head slabs).
    segments = [(0, 0, in_channels)]
    din_pad = _round_up(in_channels, LANE)
    for (w, att_src, att_dst, b) in layers:
        f = w.shape[1] // heads
        w_pad = jnp.zeros((din_pad, heads * LANE), jnp.float32)
        for h in range(heads):
            wh = w[:, h * f:(h + 1) * f]
            for (poff, roff, cnt) in segments:
                w_pad = w_pad.at[poff:poff + cnt,
                                 h * LANE:h * LANE + f].set(wh[roff:roff + cnt, :])
        asrc = jnp.zeros((heads, 1, LANE), jnp.float32).at[:, 0, :f].set(att_src)
        adst = jnp.zeros((heads, 1, LANE), jnp.float32).at[:, 0, :f].set(att_dst)
        b_pad = jnp.zeros((1, heads * LANE), jnp.float32)
        for h in range(heads):
            b_pad = b_pad.at[0, h * LANE:h * LANE + f].set(b[h * f:(h + 1) * f])
        padded.append((w_pad.astype(jnp.bfloat16), asrc, adst, b_pad))
        segments = [(h * LANE, h * f, f) for h in range(heads)]
        din_pad = heads * LANE
    return padded


# ---------------------------------------------------------------------------
# Forward pass (matches Custom_GAT.forward, eval mode, dense adjacency)
# ---------------------------------------------------------------------------
def gat_forward(padded_layers, layers, x, adj, heads):
    n, din = x.shape
    n_pad, tile_i = _choose_tiles(n)
    din_pad0 = _round_up(din, LANE)
    h = jnp.zeros((n_pad, din_pad0), jnp.float32).at[:n, :din].set(x)
    h = h.astype(jnp.bfloat16)
    adj_i8 = jnp.zeros((n_pad, n_pad), jnp.int8).at[:n, :n].set(
        (adj > 0).astype(jnp.int8))

    num_layers = len(padded_layers)
    for li, (w_all, asrc, adst, b_pad) in enumerate(padded_layers):
        last = li == num_layers - 1
        h = gat_layer_pallas(h, w_all, asrc, adst, b_pad, adj_i8,
                             apply_relu=not last,
                             out_dtype=jnp.float32 if last else jnp.bfloat16,
                             tile_i=tile_i)
        # F.dropout(..., training=False) == identity

    f_out = layers[-1][0].shape[1] // heads
    cols = [h[:n, hd * LANE:hd * LANE + f_out] for hd in range(heads)]
    return jnp.concatenate(cols, axis=1)      # (N, heads*f_out) = (N, out_channels)


# ---------------------------------------------------------------------------
# Pure-JAX dense-GAT reference (same math, mirrored bf16 MXU casts)
# ---------------------------------------------------------------------------
def gat_reference(layers, x, adj, heads, neg_slope=0.2):
    n = x.shape[0]
    h = x
    num_layers = len(layers)
    for li, (w, att_src, att_dst, b) in enumerate(layers):
        f = w.shape[1] // heads
        hh = jnp.dot(h.astype(jnp.bfloat16), w.astype(jnp.bfloat16),
                     preferred_element_type=jnp.float32).reshape(n, heads, f)
        a_s = jnp.einsum("nhf,hf->nh", hh, att_src)
        a_d = jnp.einsum("nhf,hf->nh", hh, att_dst)
        e = a_d[:, None, :] + a_s[None, :, :]            # e[i, j, head]
        e = jnp.where(e > 0.0, e, neg_slope * e)
        e = jnp.where(adj[:, :, None] > 0.0, e, -1e30)
        e = e - jnp.max(e, axis=1, keepdims=True)
        p = jnp.exp(e)
        attn = p / jnp.sum(p, axis=1, keepdims=True)      # softmax over sources j
        out = jnp.einsum("ijh,jhf->ihf", attn.astype(jnp.bfloat16),
                         hh.astype(jnp.bfloat16),
                         preferred_element_type=jnp.float32)
        out = out.reshape(n, heads * f) + b
        if li < num_layers - 1:
            out = jnp.maximum(out, 0.0)
        h = out
    return h


if __name__ == "__main__":
    # Small shapes consistent with Custom_GAT: node features (N, in_channels),
    # dense adjacency (N, N); heads divides hidden/out channels.
    N = 32
    in_channels = 16
    hidden_channels = 32
    out_channels = 8
    num_layers = 3
    heads = 4
    dropout = 0.5     # eval mode -> identity

    key = jax.random.PRNGKey(0)
    key, kx, ka = jax.random.split(key, 3)
    x = jax.random.normal(kx, (N, in_channels), jnp.float32)
    adj = (jax.random.uniform(ka, (N, N)) < 0.3).astype(jnp.float32)
    adj = jnp.maximum(adj, adj.T)                                 # undirected
    adj = jnp.maximum(adj, jnp.eye(N, dtype=jnp.float32))         # self-loops

    layers = init_gat_params(key, in_channels, hidden_channels, out_channels,
                             num_layers, heads)
    padded_layers = pad_gat_params(layers, in_channels, heads)

    out = gat_forward(padded_layers, layers, x, adj, heads)
    jax.block_until_ready(out)

    ref = gat_reference(layers, x, adj, heads)
    assert out.shape == (N, out_channels), out.shape
    max_err = float(jnp.max(jnp.abs(out - ref)))
    assert jnp.allclose(out, ref, atol=3e-2, rtol=3e-2), (
        f"mismatch vs reference (max abs err {max_err})")
    print("KERNEL_OK")
</pallas_src>

<mosaic_0001>
module attributes {stable_mosaic.version = 11 : i64} {
  func.func @_gat_proj_kernel(%arg0: i32, %arg1: memref<128x128xbf16, #tpu.memory_space<vmem>>, %arg2: memref<128x512xbf16, #tpu.memory_space<vmem>>, %arg3: memref<128x512xf32, #tpu.memory_space<vmem>>) attributes {dimension_semantics = [#tpu.dimension_semantics<parallel>], iteration_bounds = array<i64: 1>, scalar_prefetch = 0 : i64, scratch_operands = 0 : i64, tpu.core_type = #tpu.core_type<tc>, window_params = [{transform_indices = @transform_0, window_bounds = array<i64: 128, 128>}, {pipeline_mode = #tpu.pipeline_mode<synchronous>, transform_indices = @transform_1, window_bounds = array<i64: 128, 512>}, {transform_indices = @transform_2, window_bounds = array<i64: 128, 512>}]} {
    %c0 = arith.constant 0 : index
    %c0_0 = arith.constant 0 : index
    %0 = vector.load %arg1[%c0, %c0_0] : memref<128x128xbf16, #tpu.memory_space<vmem>>, vector<128x128xbf16>
    %c0_1 = arith.constant 0 : index
    %c0_2 = arith.constant 0 : index
    %1 = vector.load %arg2[%c0_1, %c0_2] : memref<128x512xbf16, #tpu.memory_space<vmem>>, vector<128x512xbf16>
    %cst = arith.constant dense<0.000000e+00> : vector<128x512xf32>
    %2 = tpu.matmul %0, %1, %cst {dimension_numbers = #tpu.dot_dimension_numbers<[1], [0], [0], [1], [0, 0, 1, 1], [], []>} : vector<128x128xbf16>, vector<128x512xbf16>, vector<128x512xf32> -> vector<128x512xf32>
    %c0_3 = arith.constant 0 : index
    %c0_4 = arith.constant 0 : index
    %3 = vector.load %arg3[%c0_3, %c0_4] : memref<128x512xf32, #tpu.memory_space<vmem>>, vector<128x512xf32>
    tpu.vector_store %arg3[%c0_3, %c0_4], %2 {strides = array<i32>} : memref<128x512xf32, #tpu.memory_space<vmem>>, vector<128x512xf32>,
    return
  }
  func.func @transform_0(%arg0: i32) -> (i32, i32) {
    %c0_i32 = arith.constant 0 : i32
    %c0_i32_0 = arith.constant 0 : i32
    return %arg0, %c0_i32 : i32, i32
  }
  func.func @transform_1(%arg0: i32) -> (i32, i32) {
    %c0_i32 = arith.constant 0 : i32
    %c0_i32_0 = arith.constant 0 : i32
    %c0_i32_1 = arith.constant 0 : i32
    return %c0_i32, %c0_i32_0 : i32, i32
  }
  func.func @transform_2(%arg0: i32) -> (i32, i32) {
    %c0_i32 = arith.constant 0 : i32
    %c0_i32_0 = arith.constant 0 : i32
    return %arg0, %c0_i32 : i32, i32
  }
}

</mosaic_0001>

<bundles_post_ra>
// kernel: tpu_custom_call.1
= control target key start
LH: loop header
LB: loop body
LE: loop exit
PB: predicated region body
PF: predicated region fallthrough
CT: control target
= control target key end

     0   :  { %7 = vsyncpa [#allocation3], 0  ;;  %s860_s0 = inlined_call_operand.hbm [shape: bf16[128,128], index: 0, kind: input, shape index: {}]   ;;  %s861_s1 = inlined_call_operand.hbm [shape: bf16[128,512], index: 1, kind: input, shape index: {}]   ;;  %s862_s2 = inlined_call_operand.hbm [shape: f32[128,512], index: 2, kind: output, shape index: {}]  }
   0x1   :  { %8 = vsyncpa [#allocation6], 0 }
   0x2   :  { %9 = vsyncpa [#allocation4], 0  ;;  %s783_s9 = smov [#allocation2]   ;;  %s711_s13 = scalar_lea.hbm %s860_s0, 1024 }
   0x3   :  { %s15_s10 = sshll.u32 %s783_s9, 4  ;;  %p712_p0 = scmp.ne.s32.totalorder %s860_s0, %s711_s13  ;;  %s16_s10 = int_to_ptr.vmem [resolvable:$true] %s15_s10 }
   0x4   :  { %p715_p1 = scmp.lt.u32.totalorder %s711_s13, %s860_s0 }
   0x6   :  { %p717_p2 = pnand %p715_p1, %p712_p0 }
   0x8   :  { %720 = shalt.err (!%p717_p2)
}
   0x9   :  { %s721_s18 = scalar_lea.vmem %s16_s10, 1024  ;;  %p726_p4 = scmp.lt.s32.totalorder %s16_s10, %s16_s10 }
   0xa   :  { %p722_p3 = scmp.ne.s32.totalorder %s16_s10, %s721_s18  ;;  %p727_p5 = scmp.lt.s32.totalorder %s721_s18, %s721_s18 }
   0xc   :  { %p728_p6 = por %p727_p5, %p726_p4 }
   0xe   :  { %p729_p7 = pnand %p728_p6, %p722_p3 }
  0x10   :  { %732 = shalt.err (!%p729_p7)
}
  0x11   :  { %s784_s19 = smov 64   ;;  %s785_s20 = smov 4  }
  0x12   :  { %21 = dma.hbm_to_vmem [thread:$0]  %s860_s0, 1024, %s16_s10, [#allocation3], %s784_s19, %s784_s19, %s785_s20  }
  0x13   :  { %s786_s23 = smov [#allocation5]   ;;  %s733_s27 = scalar_lea.hbm %s861_s1, 4096 }
  0x14   :  { %s27_s24 = sshll.u32 %s786_s23, 4  ;;  %p734_p8 = scmp.ne.s32.totalorder %s861_s1, %s733_s27  ;;  %s28_s24 = int_to_ptr.vmem [resolvable:$true] %s27_s24 }
  0x15   :  { %p737_p9 = scmp.lt.u32.totalorder %s733_s27, %s861_s1 }
  0x17   :  { %p739_p10 = pnand %p737_p9, %p734_p8 }
  0x19   :  { %742 = shalt.err (!%p739_p10)
}
  0x1a   :  { %s743_s4 = scalar_lea.vmem %s28_s24, 4096  ;;  %p748_p12 = scmp.lt.s32.totalorder %s28_s24, %s28_s24 }
  0x1b   :  { %p744_p11 = scmp.ne.s32.totalorder %s28_s24, %s743_s4  ;;  %p749_p13 = scmp.lt.s32.totalorder %s743_s4, %s743_s4 }
  0x1d   :  { %p750_p0 = por %p749_p13, %p748_p12 }
  0x1f   :  { %p751_p1 = pnand %p750_p0, %p744_p11 }
  0x21   :  { %754 = shalt.err (!%p751_p1)
}
  0x22   :  { %s787_s0 = smov 256   ;;  %s788_s5 = smov 16  }
  0x23   :  { %33 = dma.hbm_to_vmem [thread:$0]  %s861_s1, 4096, %s28_s24, [#allocation6], %s787_s0, %s787_s0, %s788_s5  }
  0x24   :  { %777 = dma.done.wait [#allocation3], 1024  }
  0x25   :  { %778 = vsyncadd [#allocation3], 4294966272 }
  0x26   :  { %779 = dma.done.wait [#allocation6], 4096  }
  0x27   :  { %780 = vsyncadd [#allocation6], 4294963200  ;;  %v789_v0 = vmov 0   ;;  %v655_v1 = vld [vmem:[#allocation5 + $0x4] ss:$16 sps:$4 sm:$0xff]   ;;  %v704_v34 = vld [vmem:[#allocation2 + $0x8] sm:$0xff]  }
  0x28   :  { %329 = vmatprep.mubr.bf16.mxu0 %v789_v0  ;;  %442 = vmatprep.mubr.bf16.mxu1 %v789_v0  ;;  %v657_v2 = vld [vmem:[#allocation5 + $0xc] ss:$16 sps:$4 sm:$0xff]   ;;  %v659_v3 = vld [vmem:[#allocation5] ss:$16 sps:$4 sm:$0xff]   ;;  %v660_v4 = vld [vmem:[#allocation5 + $0x8] ss:$16 sps:$4 sm:$0xff]  }
  0x29   :  { %297 = vmatprep.subr.bf16.mxu0 %v655_v1  ;;  %410 = vmatprep.subr.bf16.mxu1 %v657_v2  ;;  %v661_v5 = vld [vmem:[#allocation5 + $0x24] ss:$16 sps:$4 sm:$0xff]   ;;  %v663_v6 = vld [vmem:[#allocation5 + $0x2c] ss:$16 sps:$4 sm:$0xff]   ;;  %v665_v7 = vld [vmem:[#allocation5 + $0x20] ss:$16 sps:$4 sm:$0xff]  }
  0x2a   :  { %298 = vmatpush1.bf16.msra.mxu0 %v659_v3  ;;  %411 = vmatpush1.bf16.msra.mxu1 %v660_v4  ;;  %v666_v8 = vld [vmem:[#allocation5 + $0x28] ss:$16 sps:$4 sm:$0xff]   ;;  %v667_v9 = vld [vmem:[#allocation5 + $0x44] ss:$16 sps:$4 sm:$0xff]   ;;  %v669_v10 = vld [vmem:[#allocation5 + $0x4c] ss:$16 sps:$4 sm:$0xff]  }
  0x2b   :  { %299 = vmatprep.subr.bf16.mxu0 %v661_v5  ;;  %412 = vmatprep.subr.bf16.mxu1 %v663_v6  ;;  %v671_v11 = vld [vmem:[#allocation5 + $0x40] ss:$16 sps:$4 sm:$0xff]   ;;  %v672_v12 = vld [vmem:[#allocation5 + $0x48] ss:$16 sps:$4 sm:$0xff]   ;;  %v673_v13 = vld [vmem:[#allocation5 + $0x64] ss:$16 sps:$4 sm:$0xff]  }
  0x2c   :  { %v675_v14 = vld [vmem:[#allocation5 + $0x6c] ss:$16 sps:$4 sm:$0xff]   ;;  %v677_v15 = vld [vmem:[#allocation5 + $0x60] ss:$16 sps:$4 sm:$0xff]   ;;  %v678_v16 = vld [vmem:[#allocation5 + $0x68] ss:$16 sps:$4 sm:$0xff]  }
  0x2d   :  { %v679_v17 = vld [vmem:[#allocation5 + $0x84] ss:$16 sps:$4 sm:$0xff]   ;;  %v681_v18 = vld [vmem:[#allocation5 + $0x8c] ss:$16 sps:$4 sm:$0xff]   ;;  %v683_v19 = vld [vmem:[#allocation5 + $0x80] ss:$16 sps:$4 sm:$0xff]  }
  0x2e   :  { %300 = vmatpush1.bf16.msra.mxu0 %v665_v7  ;;  %413 = vmatpush1.bf16.msra.mxu1 %v666_v8  ;;  %v684_v20 = vld [vmem:[#allocation5 + $0x88] ss:$16 sps:$4 sm:$0xff]   ;;  %v685_v21 = vld [vmem:[#allocation5 + $0xa4] ss:$16 sps:$4 sm:$0xff]   ;;  %v687_v22 = vld [vmem:[#allocation5 + $0xac] ss:$16 sps:$4 sm:$0xff]  }
  0x2f   :  { %301 = vmatprep.subr.bf16.mxu0 %v667_v9  ;;  %414 = vmatprep.subr.bf16.mxu1 %v669_v10  ;;  %v689_v23 = vld [vmem:[#allocation5 + $0xa0] ss:$16 sps:$4 sm:$0xff]   ;;  %v690_v24 = vld [vmem:[#allocation5 + $0xa8] ss:$16 sps:$4 sm:$0xff]   ;;  %v691_v25 = vld [vmem:[#allocation5 + $0xc4] ss:$16 sps:$4 sm:$0xff]  }
  0x30   :  { %v693_v26 = vld [vmem:[#allocation5 + $0xcc] ss:$16 sps:$4 sm:$0xff]   ;;  %v695_v27 = vld [vmem:[#allocation5 + $0xc0] ss:$16 sps:$4 sm:$0xff]   ;;  %v696_v28 = vld [vmem:[#allocation5 + $0xc8] ss:$16 sps:$4 sm:$0xff]  }
  0x31   :  { %v697_v29 = vld [vmem:[#allocation5 + $0xe4] ss:$16 sps:$4 sm:$0xff]   ;;  %v699_v30 = vld [vmem:[#allocation5 + $0xec] ss:$16 sps:$4 sm:$0xff]   ;;  %v701_v31 = vld [vmem:[#allocation5 + $0xe0] ss:$16 sps:$4 sm:$0xff]  }
  0x32   :  { %302 = vmatpush1.bf16.msra.mxu0 %v671_v11  ;;  %415 = vmatpush1.bf16.msra.mxu1 %v672_v12  ;;  %v702_v32 = vld [vmem:[#allocation5 + $0xe8] ss:$16 sps:$4 sm:$0xff]   ;;  %v703_v33 = vld [vmem:[#allocation2] sm:$0xff]   ;;  %v705_v35 = vld [vmem:[#allocation2 + $0x10] sm:$0xff]   ;;  %s790_s1 = smov [#allocation7]  }
  0x33   :  { %303 = vmatprep.subr.bf16.mxu0 %v673_v13  ;;  %416 = vmatprep.subr.bf16.mxu1 %v675_v14  ;;  %v706_v36 = vld [vmem:[#allocation2 + $0x18] sm:$0xff]   ;;  %v707_v37 = vld [vmem:[#allocation2 + $0x20] sm:$0xff]   ;;  %v708_v38 = vld [vmem:[#allocation2 + $0x28] sm:$0xff]   ;;  %s592_s8 = sshll.u32 %s790_s1, 4  ;;  %s593_s8 = int_to_ptr.vmem [resolvable:$true] %s592_s8 }
  0x34   :  { %v709_v39 = vld [vmem:[#allocation2 + $0x30] sm:$0xff]   ;;  %v710_v40 = vld [vmem:[#allocation2 + $0x38] sm:$0xff]   ;;  %s755_s9 = scalar_lea.vmem %s593_s8, 8192  ;;  %p760_p3 = scmp.lt.s32.totalorder %s593_s8, %s593_s8 }
  0x35   :  { %p756_p2 = scmp.ne.s32.totalorder %s593_s8, %s755_s9  ;;  %p761_p4 = scmp.lt.s32.totalorder %s755_s9, %s755_s9 }
  0x36   :  { %304 = vmatpush1.bf16.msra.mxu0 %v677_v15  ;;  %417 = vmatpush1.bf16.msra.mxu1 %v678_v16 }
  0x37   :  { %305 = vmatprep.subr.bf16.mxu0 %v679_v17  ;;  %418 = vmatprep.subr.bf16.mxu1 %v681_v18  ;;  %p762_p5 = por %p761_p4, %p760_p3 }
  0x39   :  { %p763_p6 = pnand %p762_p5, %p756_p2 }
  0x3a   :  { %306 = vmatpush1.bf16.msra.mxu0 %v683_v19  ;;  %419 = vmatpush1.bf16.msra.mxu1 %v684_v20 }
  0x3b   :  { %307 = vmatprep.subr.bf16.mxu0 %v685_v21  ;;  %420 = vmatprep.subr.bf16.mxu1 %v687_v22 }
  0x3e   :  { %308 = vmatpush1.bf16.msra.mxu0 %v689_v23  ;;  %421 = vmatpush1.bf16.msra.mxu1 %v690_v24 }
  0x3f   :  { %309 = vmatprep.subr.bf16.mxu0 %v691_v25  ;;  %422 = vmatprep.subr.bf16.mxu1 %v693_v26 }
  0x42   :  { %310 = vmatpush1.bf16.msra.mxu0 %v695_v27  ;;  %423 = vmatpush1.bf16.msra.mxu1 %v696_v28 }
  0x43   :  { %311 = vmatprep.subr.bf16.mxu0 %v697_v29  ;;  %424 = vmatprep.subr.bf16.mxu1 %v699_v30 }
  0x46   :  { %312 = vmatpush1.bf16.msra.mxu0 %v701_v31  ;;  %425 = vmatpush1.bf16.msra.mxu1 %v702_v32 }
  0x49   :  { %330 = vmatmul.mubr.bf16.vlgmr.msra.gmra.mrb[0].mxu0 %v703_v33  ;;  %443 = vmatmul.mubr.bf16.vlgmr.msra.gmra.mrb[0].mxu1 %v703_v33 }
  0x4a   :  { %339 = vmatprep.mubr.bf16.mxu0 %v789_v0  ;;  %452 = vmatprep.mubr.bf16.mxu1 %v789_v0 }
  0x51   :  { %340 = vmatmul.mubr.bf16.gmra.mrb[4].mxu0 %v704_v34  ;;  %453 = vmatmul.mubr.bf16.gmra.mrb[4].mxu1 %v704_v34 }
  0x52   :  { %349 = vmatprep.mubr.bf16.mxu0 %v789_v0  ;;  %462 = vmatprep.mubr.bf16.mxu1 %v789_v0 }
  0x59   :  { %350 = vmatmul.mubr.bf16.gmra.mrb[8].mxu0 %v705_v35  ;;  %463 = vmatmul.mubr.bf16.gmra.mrb[8].mxu1 %v705_v35 }
  0x5a   :  { %359 = vmatprep.mubr.bf16.mxu0 %v789_v0  ;;  %472 = vmatprep.mubr.bf16.mxu1 %v789_v0 }
  0x61   :  { %360 = vmatmul.mubr.bf16.gmra.mrb[12].mxu0 %v706_v36  ;;  %473 = vmatmul.mubr.bf16.gmra.mrb[12].mxu1 %v706_v36 }
  0x62   :  { %369 = vmatprep.mubr.bf16.mxu0 %v789_v0  ;;  %482 = vmatprep.mubr.bf16.mxu1 %v789_v0 }
  0x69   :  { %370 = vmatmul.mubr.bf16.gmra.mrb[16].mxu0 %v707_v37  ;;  %483 = vmatmul.mubr.bf16.gmra.mrb[16].mxu1 %v707_v37 }
  0x6a   :  { %379 = vmatprep.mubr.bf16.mxu0 %v789_v0  ;;  %492 = vmatprep.mubr.bf16.mxu1 %v789_v0 }
  0x71   :  { %380 = vmatmul.mubr.bf16.gmra.mrb[20].mxu0 %v708_v38  ;;  %493 = vmatmul.mubr.bf16.gmra.mrb[20].mxu1 %v708_v38 }
  0x72   :  { %389 = vmatprep.mubr.bf16.mxu0 %v789_v0  ;;  %502 = vmatprep.mubr.bf16.mxu1 %v789_v0 }
  0x79   :  { %390 = vmatmul.mubr.bf16.gmra.mrb[24].mxu0 %v709_v39  ;;  %503 = vmatmul.mubr.bf16.gmra.mrb[24].mxu1 %v709_v39 }
  0x7a   :  { %399 = vmatprep.mubr.bf16.mxu0 %v789_v0  ;;  %512 = vmatprep.mubr.bf16.mxu1 %v789_v0 }
  0x81   :  { %400 = vmatmul.mubr.bf16.gmra.mrb[28].mxu0 %v710_v40  ;;  %513 = vmatmul.mubr.bf16.gmra.mrb[28].mxu1 %v710_v40 }
 0x11c   :  { %v331_v41 = vpop.f32.mrb[0].mxu0  ;;  %v444_v42 = vpop.f32.mrb[0].mxu1 }
 0x11d   :  { %523 = vst [vmem:[#allocation7] sm:$0xff] %v331_v41  ;;  %525 = vst [vmem:[#allocation7 + $0x10] sm:$0xff] %v444_v42  ;;  %v333_v43 = vpop.f32.mrb[1].mxu0  ;;  %v446_v44 = vpop.f32.mrb[1].mxu1 }
 0x11e   :  { %524 = vst [vmem:[#allocation7 + $0x8] sm:$0xff] %v333_v43  ;;  %526 = vst [vmem:[#allocation7 + $0x18] sm:$0xff] %v446_v44  ;;  %v335_v45 = vpop.f32.mrb[2].mxu0  ;;  %v448_v46 = vpop.f32.mrb[2].mxu1 }
 0x11f   :  { %527 = vst [vmem:[#allocation7 + $0x20] sm:$0xff] %v335_v45  ;;  %529 = vst [vmem:[#allocation7 + $0x30] sm:$0xff] %v448_v46  ;;  %v337_v47 = vpop.f32.mrb[3].mxu0  ;;  %v450_v48 = vpop.f32.mrb[3].mxu1 }
 0x120   :  { %528 = vst [vmem:[#allocation7 + $0x28] sm:$0xff] %v337_v47  ;;  %530 = vst [vmem:[#allocation7 + $0x38] sm:$0xff] %v450_v48 }
 0x124   :  { %v341_v49 = vpop.f32.mrb[4].mxu0  ;;  %v454_v50 = vpop.f32.mrb[4].mxu1 }
 0x125   :  { %531 = vst [vmem:[#allocation7 + $0x40] sm:$0xff] %v341_v49  ;;  %533 = vst [vmem:[#allocation7 + $0x50] sm:$0xff] %v454_v50  ;;  %v343_v51 = vpop.f32.mrb[5].mxu0  ;;  %v456_v52 = vpop.f32.mrb[5].mxu1 }
 0x126   :  { %532 = vst [vmem:[#allocation7 + $0x48] sm:$0xff] %v343_v51  ;;  %534 = vst [vmem:[#allocation7 + $0x58] sm:$0xff] %v456_v52  ;;  %v345_v53 = vpop.f32.mrb[6].mxu0  ;;  %v458_v54 = vpop.f32.mrb[6].mxu1 }
 0x127   :  { %535 = vst [vmem:[#allocation7 + $0x60] sm:$0xff] %v345_v53  ;;  %537 = vst [vmem:[#allocation7 + $0x70] sm:$0xff] %v458_v54  ;;  %v347_v55 = vpop.f32.mrb[7].mxu0  ;;  %v460_v56 = vpop.f32.mrb[7].mxu1 }
 0x128   :  { %536 = vst [vmem:[#allocation7 + $0x68] sm:$0xff] %v347_v55  ;;  %538 = vst [vmem:[#allocation7 + $0x78] sm:$0xff] %v460_v56 }
 0x12c   :  { %v351_v57 = vpop.f32.mrb[8].mxu0  ;;  %v464_v58 = vpop.f32.mrb[8].mxu1 }
 0x12d   :  { %539 = vst [vmem:[#allocation7 + $0x80] sm:$0xff] %v351_v57  ;;  %541 = vst [vmem:[#allocation7 + $0x90] sm:$0xff] %v464_v58  ;;  %v353_v59 = vpop.f32.mrb[9].mxu0  ;;  %v466_v60 = vpop.f32.mrb[9].mxu1 }
 0x12e   :  { %540 = vst [vmem:[#allocation7 + $0x88] sm:$0xff] %v353_v59  ;;  %542 = vst [vmem:[#allocation7 + $0x98] sm:$0xff] %v466_v60  ;;  %v355_v61 = vpop.f32.mrb[10].mxu0  ;;  %v468_v62 = vpop.f32.mrb[10].mxu1 }
 0x12f   :  { %543 = vst [vmem:[#allocation7 + $0xa0] sm:$0xff] %v355_v61  ;;  %545 = vst [vmem:[#allocation7 + $0xb0] sm:$0xff] %v468_v62  ;;  %v357_v63 = vpop.f32.mrb[11].mxu0  ;;  %v470_v0 = vpop.f32.mrb[11].mxu1 }
 0x130   :  { %544 = vst [vmem:[#allocation7 + $0xa8] sm:$0xff] %v357_v63  ;;  %546 = vst [vmem:[#allocation7 + $0xb8] sm:$0xff] %v470_v0 }
 0x134   :  { %v361_v1 = vpop.f32.mrb[12].mxu0  ;;  %v474_v2 = vpop.f32.mrb[12].mxu1 }
 0x135   :  { %547 = vst [vmem:[#allocation7 + $0xc0] sm:$0xff] %v361_v1  ;;  %549 = vst [vmem:[#allocation7 + $0xd0] sm:$0xff] %v474_v2  ;;  %v363_v3 = vpop.f32.mrb[13].mxu0  ;;  %v476_v4 = vpop.f32.mrb[13].mxu1 }
 0x136   :  { %548 = vst [vmem:[#allocation7 + $0xc8] sm:$0xff] %v363_v3  ;;  %550 = vst [vmem:[#allocation7 + $0xd8] sm:$0xff] %v476_v4  ;;  %v365_v5 = vpop.f32.mrb[14].mxu0  ;;  %v478_v6 = vpop.f32.mrb[14].mxu1 }
 0x137   :  { %551 = vst [vmem:[#allocation7 + $0xe0] sm:$0xff] %v365_v5  ;;  %553 = vst [vmem:[#allocation7 + $0xf0] sm:$0xff] %v478_v6  ;;  %v367_v7 = vpop.f32.mrb[15].mxu0  ;;  %v480_v8 = vpop.f32.mrb[15].mxu1 }
 0x138   :  { %552 = vst [vmem:[#allocation7 + $0xe8] sm:$0xff] %v367_v7  ;;  %554 = vst [vmem:[#allocation7 + $0xf8] sm:$0xff] %v480_v8 }
 0x13c   :  { %v371_v9 = vpop.f32.mrb[16].mxu0  ;;  %v484_v10 = vpop.f32.mrb[16].mxu1 }
 0x13d   :  { %555 = vst [vmem:[#allocation7 + $0x100] sm:$0xff] %v371_v9  ;;  %557 = vst [vmem:[#allocation7 + $0x110] sm:$0xff] %v484_v10  ;;  %v373_v11 = vpop.f32.mrb[17].mxu0  ;;  %v486_v12 = vpop.f32.mrb[17].mxu1 }
 0x13e   :  { %556 = vst [vmem:[#allocation7 + $0x108] sm:$0xff] %v373_v11  ;;  %558 = vst [vmem:[#allocation7 + $0x118] sm:$0xff] %v486_v12  ;;  %v375_v13 = vpop.f32.mrb[18].mxu0  ;;  %v488_v14 = vpop.f32.mrb[18].mxu1 }
 0x13f   :  { %559 = vst [vmem:[#allocation7 + $0x120] sm:$0xff] %v375_v13  ;;  %561 = vst [vmem:[#allocation7 + $0x130] sm:$0xff] %v488_v14  ;;  %v377_v15 = vpop.f32.mrb[19].mxu0  ;;  %v490_v16 = vpop.f32.mrb[19].mxu1 }
 0x140   :  { %560 = vst [vmem:[#allocation7 + $0x128] sm:$0xff] %v377_v15  ;;  %562 = vst [vmem:[#allocation7 + $0x138] sm:$0xff] %v490_v16 }
 0x144   :  { %v381_v17 = vpop.f32.mrb[20].mxu0  ;;  %v494_v18 = vpop.f32.mrb[20].mxu1 }
 0x145   :  { %563 = vst [vmem:[#allocation7 + $0x140] sm:$0xff] %v381_v17  ;;  %565 = vst [vmem:[#allocation7 + $0x150] sm:$0xff] %v494_v18  ;;  %v383_v19 = vpop.f32.mrb[21].mxu0  ;;  %v496_v20 = vpop.f32.mrb[21].mxu1 }
 0x146   :  { %564 = vst [vmem:[#allocation7 + $0x148] sm:$0xff] %v383_v19  ;;  %566 = vst [vmem:[#allocation7 + $0x158] sm:$0xff] %v496_v20  ;;  %v385_v21 = vpop.f32.mrb[22].mxu0  ;;  %v498_v22 = vpop.f32.mrb[22].mxu1 }
 0x147   :  { %567 = vst [vmem:[#allocation7 + $0x160] sm:$0xff] %v385_v21  ;;  %569 = vst [vmem:[#allocation7 + $0x170] sm:$0xff] %v498_v22  ;;  %v387_v23 = vpop.f32.mrb[23].mxu0  ;;  %v500_v24 = vpop.f32.mrb[23].mxu1 }
 0x148   :  { %568 = vst [vmem:[#allocation7 + $0x168] sm:$0xff] %v387_v23  ;;  %570 = vst [vmem:[#allocation7 + $0x178] sm:$0xff] %v500_v24 }
 0x14c   :  { %v391_v25 = vpop.f32.mrb[24].mxu0  ;;  %v504_v26 = vpop.f32.mrb[24].mxu1 }
 0x14d   :  { %571 = vst [vmem:[#allocation7 + $0x180] sm:$0xff] %v391_v25  ;;  %573 = vst [vmem:[#allocation7 + $0x190] sm:$0xff] %v504_v26  ;;  %v393_v27 = vpop.f32.mrb[25].mxu0  ;;  %v506_v28 = vpop.f32.mrb[25].mxu1 }
 0x14e   :  { %572 = vst [vmem:[#allocation7 + $0x188] sm:$0xff] %v393_v27  ;;  %574 = vst [vmem:[#allocation7 + $0x198] sm:$0xff] %v506_v28  ;;  %v395_v29 = vpop.f32.mrb[26].mxu0  ;;  %v508_v30 = vpop.f32.mrb[26].mxu1 }
 0x14f   :  { %575 = vst [vmem:[#allocation7 + $0x1a0] sm:$0xff] %v395_v29  ;;  %577 = vst [vmem:[#allocation7 + $0x1b0] sm:$0xff] %v508_v30  ;;  %v397_v31 = vpop.f32.mrb[27].mxu0  ;;  %v510_v32 = vpop.f32.mrb[27].mxu1 }
 0x150   :  { %576 = vst [vmem:[#allocation7 + $0x1a8] sm:$0xff] %v397_v31  ;;  %578 = vst [vmem:[#allocation7 + $0x1b8] sm:$0xff] %v510_v32 }
 0x154   :  { %v401_v33 = vpop.f32.mrb[28].mxu0  ;;  %v514_v34 = vpop.f32.mrb[28].mxu1 }
 0x155   :  { %579 = vst [vmem:[#allocation7 + $0x1c0] sm:$0xff] %v401_v33  ;;  %581 = vst [vmem:[#allocation7 + $0x1d0] sm:$0xff] %v514_v34  ;;  %v403_v35 = vpop.f32.mrb[29].mxu0  ;;  %v516_v36 = vpop.f32.mrb[29].mxu1 }
 0x156   :  { %580 = vst [vmem:[#allocation7 + $0x1c8] sm:$0xff] %v403_v35  ;;  %582 = vst [vmem:[#allocation7 + $0x1d8] sm:$0xff] %v516_v36  ;;  %v405_v37 = vpop.f32.mrb[30].mxu0  ;;  %v518_v38 = vpop.f32.mrb[30].mxu1 }
 0x157   :  { %583 = vst [vmem:[#allocation7 + $0x1e0] sm:$0xff] %v405_v37  ;;  %585 = vst [vmem:[#allocation7 + $0x1f0] sm:$0xff] %v518_v38  ;;  %v407_v39 = vpop.f32.mrb[31].mxu0  ;;  %v520_v40 = vpop.f32.mrb[31].mxu1 }
 0x158   :  { %584 = vst [vmem:[#allocation7 + $0x1e8] sm:$0xff] %v407_v39  ;;  %586 = vst [vmem:[#allocation7 + $0x1f8] sm:$0xff] %v520_v40 }
 0x159   :  { %766 = shalt.err (!%p763_p6)
}
 0x15a   :  { %s767_s12 = scalar_lea.hbm %s862_s2, 8192 }
 0x15b   :  { %p768_p7 = scmp.ne.s32.totalorder %s862_s2, %s767_s12  ;;  %p771_p8 = scmp.lt.u32.totalorder %s767_s12, %s862_s2 }
 0x15d   :  { %p773_p9 = pnand %p771_p8, %p768_p7 }
 0x15f   :  { %776 = shalt.err (!%p773_p9)
}
 0x160   :  { %s791_s17 = smov 512   ;;  %s792_s18 = smov 32  }
 0x161   :  { %598 = dma.vmem_to_hbm [thread:$0]  %s593_s8, 8192, %s862_s2, [#allocation4], %s791_s17, %s791_s17, %s792_s18  }
 0x162   :  { %781 = dma.done.wait [#allocation4], 8192  }
 0x163   :  { %782 = vsyncadd [#allocation4], 4294959104 }
 0x164   :  { %602 = vsyncpa [#allocation3], 1 }
 0x165   :  { %603 = vsyncpa [#allocation6], 1 }
 0x166   :  { %604 = vsyncpa [#allocation4], 1 }

</bundles_post_ra>
